<compile_context>
chip_gen: v5e
topology: v5e:2x2
jax: 0.10.0
libtpu: 0.0.40
codegen_flags: <defaults>
</compile_context>

<pallas_src>
import functools

import jax
import jax.numpy as jnp
from jax import lax
from jax.experimental import pallas as pl
from jax.experimental.pallas import tpu as pltpu

_LANE = 128
_FEAT_TILE_BUDGET_BYTES = 8 * 1024 * 1024  # double-buffered feature tile budget


def _round_up(x, m):
    return (x + m - 1) // m * m


def _pick_tk(n, m128, itemsize, max_tk=None):
    """Largest 128-multiple K tile whose double-buffer fits the budget."""
    tk = _FEAT_TILE_BUDGET_BYTES // (2 * n * itemsize)
    tk = max(_LANE, (tk // _LANE) * _LANE)
    if max_tk is not None:
        tk = min(tk, max(_LANE, (max_tk // _LANE) * _LANE))
    return min(tk, m128)


# ---------------------------------------------------------------------------
# Kernels
# ---------------------------------------------------------------------------
def _gram_kernel(feat_ref, gram_ref, acc_ref, *, inv_nm):
    # feat_ref: (N, tk) compute-dtype tile; acc_ref: (N, N) f32 accumulator.
    k = pl.program_id(0)

    @pl.when(k == 0)
    def _():
        acc_ref[...] = jnp.zeros_like(acc_ref)

    f = feat_ref[...]
    # f @ f.T without materializing a transpose: contract both on dim 1.
    acc_ref[...] += lax.dot_general(
        f, f, dimension_numbers=(((1,), (1,)), ((), ())),
        preferred_element_type=jnp.float32)

    @pl.when(k == pl.num_programs(0) - 1)
    def _():
        gram_ref[...] = acc_ref[...] * inv_nm


def _gram_mse_kernel(feat_ref, target_ref, gram_ref, loss_ref, acc_ref, *,
                     inv_nm, inv_nn):
    k = pl.program_id(0)

    @pl.when(k == 0)
    def _():
        acc_ref[...] = jnp.zeros_like(acc_ref)

    f = feat_ref[...]
    acc_ref[...] += lax.dot_general(
        f, f, dimension_numbers=(((1,), (1,)), ((), ())),
        preferred_element_type=jnp.float32)

    @pl.when(k == pl.num_programs(0) - 1)
    def _():
        g = acc_ref[...] * inv_nm
        gram_ref[...] = g
        diff = g - target_ref[...]
        loss_ref[0, 0] = jnp.sum(diff * diff) * inv_nn


# ---------------------------------------------------------------------------
# Wrappers
# ---------------------------------------------------------------------------
def _prep(x, compute_dtype, max_tk):
    a, b, c, d = x.shape
    n, m = a * b, c * d
    f = x.reshape(n, m).astype(compute_dtype)
    itemsize = jnp.dtype(compute_dtype).itemsize
    tk = _pick_tk(n, _round_up(m, _LANE), itemsize, max_tk)
    m_pad = _round_up(m, tk)
    if m_pad != m:
        # Zero padding along the contraction dim is exact for f @ f.T.
        f = jnp.pad(f, ((0, 0), (0, m_pad - m)))
    return f, n, m, tk, m_pad


def _vmem_limit(n, tk, itemsize):
    needed = (2 * n * tk * itemsize        # double-buffered feature tile
              + 4 * n * n * 4              # target + gram (x2 buffers each)
              + n * n * 4)                 # f32 accumulator scratch
    return int(min(max(needed + (4 << 20), 32 << 20), 64 << 20))


def gram_matrix(x, *, compute_dtype=jnp.bfloat16, max_tk=None):
    """x: NCHW -> (N, N) f32 Gram = f @ f.T / (a*b*c*d), N = a*b."""
    f, n, m, tk, m_pad = _prep(x, compute_dtype, max_tk)
    itemsize = jnp.dtype(compute_dtype).itemsize
    kernel = functools.partial(_gram_kernel, inv_nm=1.0 / (n * m))
    cost = pl.CostEstimate(
        flops=2 * n * n * m_pad,
        transcendentals=0,
        bytes_accessed=n * m_pad * itemsize + n * n * 4)
    return pl.pallas_call(
        kernel,
        out_shape=jax.ShapeDtypeStruct((n, n), jnp.float32),
        grid_spec=pltpu.PrefetchScalarGridSpec(
            num_scalar_prefetch=0,
            grid=(m_pad // tk,),
            in_specs=[pl.BlockSpec((n, tk), lambda k: (0, k))],
            out_specs=pl.BlockSpec((n, n), lambda k: (0, 0)),
            scratch_shapes=[pltpu.VMEM((n, n), jnp.float32)]),
        compiler_params=pltpu.CompilerParams(
            dimension_semantics=("arbitrary",),
            vmem_limit_bytes=_vmem_limit(n, tk, itemsize)),
        cost_estimate=cost,
    )(f)


def gram_and_mse(x, target_gram, *, compute_dtype=jnp.bfloat16, max_tk=None):
    """x: NCHW; target_gram: (N, N) f32.  Returns (gram (N,N) f32, loss scalar)."""
    f, n, m, tk, m_pad = _prep(x, compute_dtype, max_tk)
    itemsize = jnp.dtype(compute_dtype).itemsize
    kernel = functools.partial(_gram_mse_kernel,
                               inv_nm=1.0 / (n * m), inv_nn=1.0 / (n * n))
    cost = pl.CostEstimate(
        flops=2 * n * n * m_pad + 3 * n * n,
        transcendentals=0,
        bytes_accessed=n * m_pad * itemsize + 2 * n * n * 4 + 4)
    gram, loss = pl.pallas_call(
        kernel,
        out_shape=(
            jax.ShapeDtypeStruct((n, n), jnp.float32),
            jax.ShapeDtypeStruct((1, 1), jnp.float32),
        ),
        grid_spec=pltpu.PrefetchScalarGridSpec(
            num_scalar_prefetch=0,
            grid=(m_pad // tk,),
            in_specs=[
                pl.BlockSpec((n, tk), lambda k: (0, k)),       # feature K tile
                pl.BlockSpec((n, n), lambda k: (0, 0)),        # resident target
            ],
            out_specs=(
                pl.BlockSpec((n, n), lambda k: (0, 0)),
                pl.BlockSpec(memory_space=pltpu.MemorySpace.SMEM),
            ),
            scratch_shapes=[pltpu.VMEM((n, n), jnp.float32)]),
        compiler_params=pltpu.CompilerParams(
            dimension_semantics=("arbitrary",),
            vmem_limit_bytes=_vmem_limit(n, tk, itemsize)),
        cost_estimate=cost,
    )(f, target_gram.astype(jnp.float32))
    return gram, loss[0, 0]


class StyleLoss:
    """JAX/Pallas port of the PyTorch StyleLoss module.

    Note: like the PyTorch module, `self.loss` is Python-side state; if you
    embed this in a jitted training step, call `gram_and_mse` directly and
    thread the loss through functionally.
    """

    def __init__(self, target_feature, *, compute_dtype=jnp.bfloat16, max_tk=None):
        self._compute_dtype = compute_dtype
        self._max_tk = max_tk
        # Gram-only kernel on the init path (no zero-target DMA, no dummy MSE).
        self.target = gram_matrix(target_feature, compute_dtype=compute_dtype,
                                  max_tk=max_tk)
        self.loss = None

    def __call__(self, x):
        _, self.loss = gram_and_mse(x, self.target,
                                    compute_dtype=self._compute_dtype,
                                    max_tk=self._max_tk)
        return x  # forward returns its input unchanged


# ---------------------------------------------------------------------------
# Reference + self-test
# ---------------------------------------------------------------------------
def _ref_gram(x, compute_dtype):
    a, b, c, d = x.shape
    f = x.reshape(a * b, c * d).astype(compute_dtype)
    g = jnp.dot(f, f.T, preferred_element_type=jnp.float32)
    return g / (a * b * c * d)


if __name__ == "__main__":
    key = jax.random.PRNGKey(0)
    k_tgt, k_in = jax.random.split(key)

    # Small conv-feature-map shapes: (batch=2, C=4, H=W=16) -> N=8, M=256.
    target_feature = jax.random.normal(k_tgt, (2, 4, 16, 16), dtype=jnp.float32)
    x = jax.random.normal(k_in, (2, 4, 16, 16), dtype=jnp.float32)

    # max_tk=128 forces a 2-step K grid so the accumulator path is exercised.
    module = StyleLoss(target_feature, max_tk=128)
    out = module(x)
    jax.block_until_ready((out, module.loss, module.target))

    # Pure-JAX reference (same bf16 MXU inputs, f32 accumulation).
    ref_target = _ref_gram(target_feature, jnp.bfloat16)
    ref_gram = _ref_gram(x, jnp.bfloat16)
    ref_loss = jnp.mean((ref_gram - ref_target) ** 2)

    assert jnp.allclose(module.target, ref_target, atol=1e-6, rtol=1e-4)
    assert jnp.allclose(module.loss, ref_loss, atol=1e-6, rtol=1e-4)
    assert jnp.array_equal(out, x)  # forward is identity on the activations

    print("KERNEL_OK")
</pallas_src>

<mosaic_0001>
module attributes {stable_mosaic.version = 11 : i64} {
  func.func @_gram_kernel(%arg0: i32, %arg1: memref<8x128xbf16, #tpu.memory_space<vmem>>, %arg2: memref<8x8xf32, #tpu.memory_space<vmem>>, %arg3: memref<8x8xf32, #tpu.memory_space<vmem>>) attributes {dimension_semantics = [#tpu.dimension_semantics<arbitrary>], iteration_bounds = array<i64: 2>, scalar_prefetch = 0 : i64, scratch_operands = 1 : i64, tpu.core_type = #tpu.core_type<tc>, window_params = [{transform_indices = @transform_0, window_bounds = array<i64: 8, 128>}, {pipeline_mode = #tpu.pipeline_mode<synchronous>, transform_indices = @transform_1, window_bounds = array<i64: 8, 8>}]} {
    %c0_i32 = arith.constant 0 : i32
    %0 = arith.cmpi eq, %arg0, %c0_i32 : i32
    %1 = arith.extui %0 : i1 to i32
    %c0_i32_0 = arith.constant 0 : i32
    %2 = arith.cmpi ne, %1, %c0_i32_0 : i32
    scf.if %2 {
      %cst_7 = arith.constant 0.000000e+00 : f32
      %11 = vector.broadcast %cst_7 : f32 to vector<8x8xf32>
      %c0_8 = arith.constant 0 : index
      %c0_9 = arith.constant 0 : index
      %12 = vector.load %arg3[%c0_8, %c0_9] : memref<8x8xf32, #tpu.memory_space<vmem>>, vector<8x8xf32>
      tpu.vector_store %arg3[%c0_8, %c0_9], %11 {strides = array<i32>} : memref<8x8xf32, #tpu.memory_space<vmem>>, vector<8x8xf32>,
    } else {
    }
    %c0 = arith.constant 0 : index
    %c0_1 = arith.constant 0 : index
    %3 = vector.load %arg1[%c0, %c0_1] : memref<8x128xbf16, #tpu.memory_space<vmem>>, vector<8x128xbf16>
    %c0_2 = arith.constant 0 : index
    %c0_3 = arith.constant 0 : index
    %4 = vector.load %arg3[%c0_2, %c0_3] : memref<8x8xf32, #tpu.memory_space<vmem>>, vector<8x8xf32>
    %cst = arith.constant dense<0.000000e+00> : vector<8x8xf32>
    %5 = tpu.matmul %3, %3, %cst {dimension_numbers = #tpu.dot_dimension_numbers<[1], [1], [0], [0], [0, 0, 1, 0], [], []>} : vector<8x128xbf16>, vector<8x128xbf16>, vector<8x8xf32> -> vector<8x8xf32>
    %6 = arith.addf %4, %5 : vector<8x8xf32>
    %c0_4 = arith.constant 0 : index
    %c0_5 = arith.constant 0 : index
    %7 = vector.load %arg3[%c0_4, %c0_5] : memref<8x8xf32, #tpu.memory_space<vmem>>, vector<8x8xf32>
    tpu.vector_store %arg3[%c0_4, %c0_5], %6 {strides = array<i32>} : memref<8x8xf32, #tpu.memory_space<vmem>>, vector<8x8xf32>,
    %c1_i32 = arith.constant 1 : i32
    %8 = arith.cmpi eq, %arg0, %c1_i32 : i32
    %9 = arith.extui %8 : i1 to i32
    %c0_i32_6 = arith.constant 0 : i32
    %10 = arith.cmpi ne, %9, %c0_i32_6 : i32
    scf.if %10 {
      %c0_7 = arith.constant 0 : index
      %c0_8 = arith.constant 0 : index
      %11 = vector.load %arg3[%c0_7, %c0_8] : memref<8x8xf32, #tpu.memory_space<vmem>>, vector<8x8xf32>
      %cst_9 = arith.constant 4.8828125E-4 : f32
      %12 = vector.broadcast %cst_9 : f32 to vector<8x8xf32>
      %13 = arith.mulf %11, %12 : vector<8x8xf32>
      %c0_10 = arith.constant 0 : index
      %c0_11 = arith.constant 0 : index
      %14 = vector.load %arg2[%c0_10, %c0_11] : memref<8x8xf32, #tpu.memory_space<vmem>>, vector<8x8xf32>
      tpu.vector_store %arg2[%c0_10, %c0_11], %13 {strides = array<i32>} : memref<8x8xf32, #tpu.memory_space<vmem>>, vector<8x8xf32>,
    } else {
    }
    return
  }
  func.func @transform_0(%arg0: i32) -> (i32, i32) {
    %c0_i32 = arith.constant 0 : i32
    %c0_i32_0 = arith.constant 0 : i32
    return %c0_i32, %arg0 : i32, i32
  }
  func.func @transform_1(%arg0: i32) -> (i32, i32) {
    %c0_i32 = arith.constant 0 : i32
    %c0_i32_0 = arith.constant 0 : i32
    %c0_i32_1 = arith.constant 0 : i32
    return %c0_i32, %c0_i32_0 : i32, i32
  }
}

</mosaic_0001>

<bundles_post_ra>
// kernel: tpu_custom_call.1
= control target key start
LH: loop header
LB: loop body
LE: loop exit
PB: predicated region body
PF: predicated region fallthrough
CT: control target
= control target key end

     0   :  { %6 = vsyncpa [#allocation4], 0  ;;  %s478_s0 = inlined_call_operand.hbm [shape: bf16[8,256], index: 0, kind: input, shape index: {}]   ;;  %s479_s1 = inlined_call_operand.hbm [shape: f32[8,8], index: 1, kind: output, shape index: {}]  }
   0x1   :  { %8 = vsyncpa [#allocation4 + $0x1], 0 }
   0x2   :  { %9 = vsyncpa [#allocation5], 0  ;;  %s383_s6 = smov 0   ;;  %s385_s7 = smov 0  }
   0x3   :  { %s387_s8 = smov 0   ;;  %s389_s9 = smov 0  }
   0x4 LB: > { %s402_s10 = sadd.s32 4294967295, %s369_s9   ;;  %s405_s11 = sadd.s32 1, %s369_s9   ;;  %s369_s9 = sphi %s389_s9, %s486_s9   ;;  %s365_s8 = sphi %s387_s8, %s485_s8   ;;  %s361_s7 = sphi %s385_s7, %s484_s7   ;;  %s357_s6 = sphi %s383_s6, %s483_s6  }
   0x5   : > { %s19_s12 = ssub.s32 %s369_s9, %s405_s11  ;;  %s22_s13 = sadd.s32 1, %s365_s8 }
   0x6   : > { %p20_p0 = scmp.eq.s32.totalorder %s19_s12, 0  ;;  %p29_p1 = scmp.ne.s32.totalorder %s365_s8, %s361_s7 }
   0x7   : > { %p30_p2 = scmp.eq.s32.totalorder %s369_s9, 0  ;;  %p35_p3 = scmp.ne.s32.totalorder %s361_s7, %s357_s6 }
   0x8   : > { %s415_s14 = scalar_select %p20_p0, %s365_s8, %s22_s13  }
   0x9   : > { %p417_p4 = por %p30_p2, %p29_p1  ;;  %p36_p5 = scmp.eq.s32.totalorder %s402_s10, 0 }
   0xa   : > { %p236_p6 = scmp.lt.s32.totalorder %s369_s9, 2  ;;  %s80_s17 = sand.u32 1, %s365_s8  }
   0xb   : > { %p423_p7 = por %p36_p5, %p35_p3  ;;  %s216_s18 = sshll.u32 %s80_s17, 2 }
   0xc   : > { %s217_s19 = sshll.u32 %s369_s9, 2  ;;  %s84_s23 = scalar_lea.vmem [#allocation3], %s216_s18 }
   0xd   : > { %s88_s22 = scalar_lea.hbm %s478_s0, %s217_s19  ;;  %s92_s24 = sshll.u32 %s84_s23, 4  ;;  %s93_s24 = int_to_ptr.vmem [resolvable:$true] %s92_s24 }
   0xe   : > { %s90_s25 = sshll.u32 %s88_s22, 4  ;;  %p434_p8 = pnand %p236_p6, %p417_p4  ;;  %s91_s25 = int_to_ptr.hbm [resolvable:$true] %s90_s25 }
   0xf   : > { %p218_p9 = scmp.ge.s32.totalorder %s369_s9, 1  ;;  %p97_p10 = scmp.lt.s32.totalorder %s369_s9, 3 }
  0x10   : > { %s81_s27 = scalar_lea.sflag [#allocation4], %s80_s17  ;;  %s273_s28 = sshra.s32 %s91_s25, 4  ;;  %s274_s28 = int_to_ptr.hbm [resolvable:$true] %s273_s28 }
  0x11   : > { %s275_s29 = scalar_lea.hbm %s274_s28, 4  ;;  %p277_p12 = pneg %p434_p8 }
  0x12   : > { %p276_p11 = scmp.ne.s32.totalorder %s274_s28, %s275_s29  ;;  %s280_s3 = scalar_lea.hbm %s478_s0, 8 }
  0x13   : > { %p281_p1 = scmp.lt.s32.totalorder %s274_s28, %s478_s0  ;;  %p282_p2 = scmp.lt.s32.totalorder %s280_s3, %s275_s29 }
  0x14   : > { %p278_p13 = pnand %p277_p12, %p276_p11 }
  0x15   : > { %p283_p3 = por %p282_p2, %p281_p1 }
  0x16   : > { %p279_p0 = pneg %p278_p13 }
  0x18   : > { %p284_p4 = pnand %p283_p3, %p279_p0 }
  0x1a   : > { %287 = shalt.err (!%p284_p4)
}
  0x1b   : > { %235 = dma.hbm_to_vmem [thread:$0]  (!%p434_p8), %s91_s25, 64, %s93_s24, %s81_s27  }
  0x1c   : > { %p98_p5 = pnand %p218_p9, %p97_p10 }
  0x1d   : > { %s103_s6 = sand.u32 (!%p98_p5), 1, %s361_s7  }
  0x1e   : > { %101 = sbr.rel (%p98_p5) target bundleno = 197 (0xc5), region = 24  ;;  %s219_s12 = sshll.u32 (!%p98_p5), %s103_s6, 2 }
  0x1f   : > { %s104_s13 = scalar_lea.sflag (!%p98_p5), [#allocation4], %s103_s6  ;;  %s107_s15 = scalar_lea.vmem (!%p98_p5), [#allocation3], %s219_s12 }
  0x23   : > { %348 = dma.done.wait (%p423_p7), %s104_s13, 64  }
  0x24   : > { %350 = vsyncadd (%p423_p7), %s104_s13, 4294967232  ;;  %p220_p6 = scmp.ne.s32.totalorder %s402_s10, 0 }
  0x26   : > { %126 = sbr.rel (%p220_p6) target bundleno = 45 (0x2d), region = 32 }
  0x2b   : > { %vm127_vm0 = vcmask 64512   ;;  %v371_v0 = vmov 0.0  }
  0x2c   : > { %128 = vst.msk [vmem:[#allocation2] sm:$0xff] %vm127_vm0, %v371_v0 }
  0x2d PF: > { %v129_v1 = vld [vmem:[%s107_s15] sm:$0xf]  ;;  %vm145_vm1 = vcmask 64512   ;;  %p221_p8 = scmp.ne.s32.totalorder %s402_s10, 1 }
  0x2e   : > { %138 = vmatpush.bf16.xpose.msra.mxu0 %v129_v1 }
  0x33   : > { %v130_v2 = vld [vmem:[#allocation2] sm:$0xff] }
  0x35   : > { %139 = vmatmul.bf16.vlgmr.msra.gmra.mxu0 %v129_v1 }
  0xb2   : > { %v140_v3 = vpop.f32.mrf.mxu0 }
  0xb3   : > { %v144_v4 = vadd.f32 %v140_v3, %v130_v2 }
  0xb5   : > { %146 = vst.msk [vmem:[#allocation2] sm:$0xff] %vm145_vm1, %v144_v4 }
  0xb6   : > { %150 = sbr.rel (%p221_p8) target bundleno = 192 (0xc0), region = 36 }
  0xba   : > { %v142_v5 = vpop.f32.mrf.mxu0 }
  0xbc   : > { %v151_v6 = vld [vmem:[#allocation2] sm:$0xff] }
  0xbd   : > { %v152_v7 = vmul.f32 0.00048828125, %v151_v6 }
  0xbf   : > { %153 = vst.msk [vmem:[#allocation6] sm:$0xff] %vm145_vm1, %v152_v7 }
  0xc0 PF: > { %p237_p7 = scmp.eq.s32.totalorder %s402_s10, 1  ;;  %s372_s9 = smov [#allocation6]  }
  0xc1   : > { %s160_s16 = sshll.u32 %s372_s9, 4  ;;  %s162_s19 = sshll.u32 %s479_s1, 4  ;;  %s161_s16 = int_to_ptr.vmem [resolvable:$true] %s160_s16  ;;  %s163_s19 = int_to_ptr.hbm [resolvable:$true] %s162_s19 }
  0xc2   : > { %229 = dma.vmem_to_hbm [thread:$0]  (%p237_p7), %s161_s16, 128, %s163_s19, [#allocation5]  }
  0xc3   : > { %352 = dma.done.wait (%p237_p7), [#allocation5], 128  }
  0xc4   : > { %354 = vsyncadd (%p237_p7), [#allocation5], 4294967168 }
  0xc5 PF: > { %p12_p9 = scmp.ge.s32.totalorder %s405_s11, 4   ;;  %s483_s6 = smov %s361_s7 }
  0xc6   : > { %s484_s7 = smov %s365_s8  ;;  %s485_s8 = smov %s415_s14 }
  0xc7   : > { %s486_s9 = smov %s405_s11  ;;  %14 = sbr.rel (!%p12_p9) target bundleno = 4 (0x4), region = 69 }
  0xcc   :  { %176 = vsyncpa [#allocation4], 1 }
  0xcd   :  { %178 = vsyncpa [#allocation4 + $0x1], 1 }
  0xce   :  { %179 = vsyncpa [#allocation5], 1 }
  0xcf   :  { %181 = vsyncpa [#allocation5 + $0x1], 1 }

</bundles_post_ra>
